<compile_context>
chip_gen: v6e
topology: v6e:2x2x1
jax: 0.10.0
libtpu: 0.0.40
codegen_flags: <defaults>
</compile_context>

<pallas_src>
import functools
import math

import jax
import jax.numpy as jnp
from jax.experimental import pallas as pl
from jax.experimental.pallas import tpu as pltpu

_LANE = 128
_TARGET_BLOCK_BYTES = 1 << 20   # ~1 MiB per input block (HBM roofline knee)
_MIN_TILES = 4                  # give v7x's 2 TensorCores >= 2 tiles each when possible


def _cdiv(a, b):
    return -(-a // b)


def _round_up(n, m):
    return _cdiv(n, m) * m


def _sublane_multiple(*dtypes):
    # dtype-aware row packing: f32 -> 8 rows, bf16 -> 16, int8/fp8 -> 32
    return max(8 * max(1, 4 // jnp.dtype(d).itemsize) for d in dtypes)


def _mse_partial_kernel(x_ref, y_ref, out_ref, *, tile_rows, valid_rows, needs_mask):
    """Per-tile partial sum of squared differences.

    Reduces over the sublane (row) axis only, producing a lane-dense (1, 128)
    partial; the cheap final reduction over tiles/lanes happens in JAX.
    Rows beyond `valid_rows` (partial last grid tile) are masked to zero.
    """
    d = x_ref[...].astype(jnp.float32) - y_ref[...].astype(jnp.float32)
    if needs_mask:
        row = (pl.program_id(0) * tile_rows
               + jax.lax.broadcasted_iota(jnp.int32, d.shape, 0))
        d = jnp.where(row < valid_rows, d, 0.0)
    out_ref[...] = jnp.sum(d * d, axis=0, keepdims=True)


def _mse_mean_pallas(xt, yt):
    """nn.MSELoss(reduction='mean') for one (x, y) pair via a tiled Pallas kernel."""
    if xt.shape != yt.shape:
        xt, yt = jnp.broadcast_arrays(xt, yt)
    numel = math.prod(xt.shape)
    if numel == 0:
        # Matches PyTorch: MSELoss(reduction='mean') on empty input is NaN.
        return jnp.float32(jnp.nan)

    rows = _cdiv(numel, _LANE)
    sub = _sublane_multiple(xt.dtype, yt.dtype)
    max_item = max(jnp.dtype(xt.dtype).itemsize, jnp.dtype(yt.dtype).itemsize)
    cap_rows = max(sub, _TARGET_BLOCK_BYTES // (_LANE * max_item))

    # Balanced tiling: pick the tile count first, then the per-tile row share.
    num_tiles = max(_cdiv(rows, cap_rows), min(_MIN_TILES, _cdiv(rows, sub)))
    tile_rows = _round_up(_cdiv(rows, num_tiles), sub)
    num_tiles = _cdiv(rows, tile_rows)

    xf = xt.reshape(-1)
    yf = yt.reshape(-1)
    if numel % _LANE == 0:
        # Zero-copy: reshape is a bitcast; any tile-boundary overhang of the
        # last grid step is handled by the in-kernel row mask.
        arr_rows = rows
        x2 = xf.reshape(arr_rows, _LANE)
        y2 = yf.reshape(arr_rows, _LANE)
    else:
        # Ragged tail (< 128 elements): one padded copy up to a full, balanced
        # tile grid (waste < num_tiles * sub rows, i.e. a few KiB).
        arr_rows = num_tiles * tile_rows
        pad = arr_rows * _LANE - numel
        x2 = jnp.pad(xf, (0, pad)).reshape(arr_rows, _LANE)
        y2 = jnp.pad(yf, (0, pad)).reshape(arr_rows, _LANE)
    needs_mask = (num_tiles * tile_rows) != arr_rows

    # VMEM budget: 2x double-buffered input blocks + f32 diff temporaries + slop.
    block_in_bytes = tile_rows * _LANE * (x2.dtype.itemsize + y2.dtype.itemsize)
    f32_tmp_bytes = tile_rows * _LANE * 4
    vmem_limit = int(min(64 << 20,
                         max(4 << 20, 2 * block_in_bytes + 4 * f32_tmp_bytes + (1 << 20))))

    kernel = functools.partial(
        _mse_partial_kernel,
        tile_rows=tile_rows, valid_rows=arr_rows, needs_mask=needs_mask)

    partials = pl.pallas_call(
        kernel,
        out_shape=jax.ShapeDtypeStruct((1, num_tiles * _LANE), jnp.float32),
        grid_spec=pl.GridSpec(
            grid=(num_tiles,),
            in_specs=[
                pl.BlockSpec((tile_rows, _LANE), lambda i: (i, 0)),
                pl.BlockSpec((tile_rows, _LANE), lambda i: (i, 0)),
            ],
            out_specs=pl.BlockSpec((1, _LANE), lambda i: (0, i)),
        ),
        compiler_params=pltpu.CompilerParams(
            dimension_semantics=("parallel",),
            vmem_limit_bytes=vmem_limit),
        cost_estimate=pl.CostEstimate(
            flops=3 * arr_rows * _LANE,
            transcendentals=0,
            bytes_accessed=arr_rows * _LANE * (x2.dtype.itemsize + y2.dtype.itemsize)
                           + num_tiles * _LANE * 4),
    )(x2, y2)

    return jnp.sum(partials) / numel


def multiple_mse_loss(x, y, reduction="mean"):
    """Functional MultipleMSELoss.forward.

    Args:
      x: list of prediction arrays.
      y: list whose elements are target arrays, or tuples (target, weight) or
         (target, weight, 'mse'), mirroring the PyTorch module.
      reduction: only 'mean' (the module default) is implemented in Pallas.
    Returns:
      (loss_sum: scalar f32, multi_loss: list of per-pair scalar losses)
    """
    if reduction != "mean":
        # TODO(synk): reduction='none' (per-element loss tensors) not implemented.
        raise NotImplementedError("only reduction='mean' is supported")

    loss_sum = 0.0
    multi_loss = []
    for xt, yt in zip(x, y):
        if isinstance(yt, tuple):
            if len(yt) == 2:
                yt, wt = yt
                lt = "mse"
            elif len(yt) == 3:
                yt, wt, lt = yt
            else:
                raise NotImplementedError
        else:
            wt, lt = 1.0, "mse"
        if lt == "mse":
            loss = _mse_mean_pallas(xt, yt)
        else:
            raise NotImplementedError
        loss_sum = loss_sum + loss * wt
        multi_loss.append(loss)
    return loss_sum, multi_loss


if __name__ == "__main__":
    key = jax.random.PRNGKey(0)
    ks = jax.random.split(key, 8)

    # SlowFast-style multi-pathway (pred, target) pairs of different shapes/dtypes.
    x0 = jax.random.normal(ks[0], (2, 4, 16, 16), dtype=jnp.float32)   # 2048 elems: zero-copy, 2 tiles
    y0 = jax.random.normal(ks[1], (2, 4, 16, 16), dtype=jnp.float32)
    x1 = jax.random.normal(ks[2], (2, 8, 24), dtype=jnp.float32)       # 384 elems: partial tile, mask path
    y1 = jax.random.normal(ks[3], (2, 8, 24), dtype=jnp.float32)
    x2 = jax.random.normal(ks[4], (2, 8, 25), dtype=jnp.float32)       # 400 elems: ragged tail, pad path
    y2 = jax.random.normal(ks[5], (2, 8, 25), dtype=jnp.float32)
    x3 = jax.random.normal(ks[6], (2, 4, 32), dtype=jnp.bfloat16)      # bf16 packing path
    y3 = jax.random.normal(ks[7], (2, 4, 32), dtype=jnp.bfloat16)

    @jax.jit
    def run(x0, y0, x1, y1, x2, y2, x3, y3):
        # targets carry explicit (tensor, weight[, 'mse']) tuples, as the module allows
        return multiple_mse_loss(
            [x0, x1, x2, x3],
            [y0, (y1, 0.5), (y2, 2.0, "mse"), y3])

    loss_sum, multi_loss = run(x0, y0, x1, y1, x2, y2, x3, y3)
    jax.block_until_ready((loss_sum, multi_loss))

    # Pure-jnp reference mirroring the PyTorch forward (f32 accumulation).
    def ref_mse(a, b):
        return jnp.mean((a.astype(jnp.float32) - b.astype(jnp.float32)) ** 2)

    refs = [ref_mse(x0, y0), ref_mse(x1, y1), ref_mse(x2, y2), ref_mse(x3, y3)]
    ref_sum = refs[0] * 1.0 + refs[1] * 0.5 + refs[2] * 2.0 + refs[3] * 1.0

    for got, want in zip(multi_loss, refs):
        assert jnp.allclose(got, want, rtol=1e-5, atol=1e-6), (got, want)
    assert jnp.allclose(loss_sum, ref_sum, rtol=1e-5, atol=1e-6), (loss_sum, ref_sum)

    print("KERNEL_OK")
</pallas_src>

<mosaic_0001>
module attributes {stable_mosaic.version = 11 : i64} {
  func.func @_mse_partial_kernel(%arg0: i32, %arg1: memref<8x128xf32, #tpu.memory_space<vmem>>, %arg2: memref<8x128xf32, #tpu.memory_space<vmem>>, %arg3: memref<1x128xf32, #tpu.memory_space<vmem>>) attributes {dimension_semantics = [#tpu.dimension_semantics<parallel>], iteration_bounds = array<i64: 2>, scalar_prefetch = 0 : i64, scratch_operands = 0 : i64, tpu.core_type = #tpu.core_type<tc>, window_params = [{transform_indices = @transform_0, window_bounds = array<i64: 8, 128>}, {transform_indices = @transform_1, window_bounds = array<i64: 8, 128>}, {transform_indices = @transform_2, window_bounds = array<i64: 1, 128>}]} {
    %c0 = arith.constant 0 : index
    %c0_0 = arith.constant 0 : index
    %0 = vector.load %arg1[%c0, %c0_0] : memref<8x128xf32, #tpu.memory_space<vmem>>, vector<8x128xf32>
    %c0_1 = arith.constant 0 : index
    %c0_2 = arith.constant 0 : index
    %1 = vector.load %arg2[%c0_1, %c0_2] : memref<8x128xf32, #tpu.memory_space<vmem>>, vector<8x128xf32>
    %2 = arith.subf %0, %1 : vector<8x128xf32>
    %3 = arith.mulf %2, %2 : vector<8x128xf32>
    %cst = arith.constant dense<0.000000e+00> : vector<128xf32>
    %4 = vector.multi_reduction <add>, %3, %cst [0] : vector<8x128xf32> to vector<128xf32>
    %5 = vector.shape_cast %4 : vector<128xf32> to vector<1x128xf32>
    %c0_3 = arith.constant 0 : index
    %c0_4 = arith.constant 0 : index
    %6 = vector.load %arg3[%c0_3, %c0_4] : memref<1x128xf32, #tpu.memory_space<vmem>>, vector<1x128xf32>
    tpu.vector_store %arg3[%c0_3, %c0_4], %5 {strides = array<i32>} : memref<1x128xf32, #tpu.memory_space<vmem>>, vector<1x128xf32>,
    return
  }
  func.func @transform_0(%arg0: i32) -> (i32, i32) {
    %c0_i32 = arith.constant 0 : i32
    %c0_i32_0 = arith.constant 0 : i32
    return %arg0, %c0_i32 : i32, i32
  }
  func.func @transform_1(%arg0: i32) -> (i32, i32) {
    %c0_i32 = arith.constant 0 : i32
    %c0_i32_0 = arith.constant 0 : i32
    return %arg0, %c0_i32 : i32, i32
  }
  func.func @transform_2(%arg0: i32) -> (i32, i32) {
    %c0_i32 = arith.constant 0 : i32
    %c0_i32_0 = arith.constant 0 : i32
    return %c0_i32, %arg0 : i32, i32
  }
}

module attributes {stable_mosaic.version = 11 : i64} {
  func.func @_mse_partial_kernel(%arg0: i32, %arg1: memref<8x128xf32, #tpu.memory_space<vmem>>, %arg2: memref<8x128xf32, #tpu.memory_space<vmem>>, %arg3: memref<1x128xf32, #tpu.memory_space<vmem>>) attributes {dimension_semantics = [#tpu.dimension_semantics<parallel>], iteration_bounds = array<i64: 1>, scalar_prefetch = 0 : i64, scratch_operands = 0 : i64, tpu.core_type = #tpu.core_type<tc>, window_params = [{transform_indices = @transform_0, window_bounds = array<i64: 8, 128>}, {transform_indices = @transform_1, window_bounds = array<i64: 8, 128>}, {transform_indices = @transform_2, window_bounds = array<i64: 1, 128>}]} {
    %c0 = arith.constant 0 : index
    %c0_0 = arith.constant 0 : index
    %0 = vector.load %arg1[%c0, %c0_0] : memref<8x128xf32, #tpu.memory_space<vmem>>, vector<8x128xf32>
    %c0_1 = arith.constant 0 : index
    %c0_2 = arith.constant 0 : index
    %1 = vector.load %arg2[%c0_1, %c0_2] : memref<8x128xf32, #tpu.memory_space<vmem>>, vector<8x128xf32>
    %2 = arith.subf %0, %1 : vector<8x128xf32>
    %c8_i32 = arith.constant 8 : i32
    %3 = arith.muli %arg0, %c8_i32 : i32
    %4 = tpu.iota {dimensions = array<i32: 0>} : vector<8x128xi32>
    %5 = vector.broadcast %3 : i32 to vector<8x128xi32>
    %6 = arith.addi %5, %4 : vector<8x128xi32>
    %c3_i32 = arith.constant 3 : i32
    %7 = vector.broadcast %c3_i32 : i32 to vector<8x128xi32>
    %8 = arith.cmpi slt, %6, %7 : vector<8x128xi32>
    %cst = arith.constant 0.000000e+00 : f32
    %9 = vector.broadcast %cst : f32 to vector<8x128xf32>
    %10 = arith.select %8, %2, %9 : vector<8x128xi1>, vector<8x128xf32>
    %11 = arith.mulf %10, %10 : vector<8x128xf32>
    %cst_3 = arith.constant dense<0.000000e+00> : vector<128xf32>
    %12 = vector.multi_reduction <add>, %11, %cst_3 [0] : vector<8x128xf32> to vector<128xf32>
    %13 = vector.shape_cast %12 : vector<128xf32> to vector<1x128xf32>
    %c0_4 = arith.constant 0 : index
    %c0_5 = arith.constant 0 : index
    %14 = vector.load %arg3[%c0_4, %c0_5] : memref<1x128xf32, #tpu.memory_space<vmem>>, vector<1x128xf32>
    tpu.vector_store %arg3[%c0_4, %c0_5], %13 {strides = array<i32>} : memref<1x128xf32, #tpu.memory_space<vmem>>, vector<1x128xf32>,
    return
  }
  func.func @transform_0(%arg0: i32) -> (i32, i32) {
    %c0_i32 = arith.constant 0 : i32
    %c0_i32_0 = arith.constant 0 : i32
    return %arg0, %c0_i32 : i32, i32
  }
  func.func @transform_1(%arg0: i32) -> (i32, i32) {
    %c0_i32 = arith.constant 0 : i32
    %c0_i32_0 = arith.constant 0 : i32
    return %arg0, %c0_i32 : i32, i32
  }
  func.func @transform_2(%arg0: i32) -> (i32, i32) {
    %c0_i32 = arith.constant 0 : i32
    %c0_i32_0 = arith.constant 0 : i32
    return %c0_i32, %arg0 : i32, i32
  }
}

module attributes {stable_mosaic.version = 11 : i64} {
  func.func @_mse_partial_kernel(%arg0: i32, %arg1: memref<8x128xf32, #tpu.memory_space<vmem>>, %arg2: memref<8x128xf32, #tpu.memory_space<vmem>>, %arg3: memref<1x128xf32, #tpu.memory_space<vmem>>) attributes {dimension_semantics = [#tpu.dimension_semantics<parallel>], iteration_bounds = array<i64: 1>, scalar_prefetch = 0 : i64, scratch_operands = 0 : i64, tpu.core_type = #tpu.core_type<tc>, window_params = [{transform_indices = @transform_0, window_bounds = array<i64: 8, 128>}, {transform_indices = @transform_1, window_bounds = array<i64: 8, 128>}, {transform_indices = @transform_2, window_bounds = array<i64: 1, 128>}]} {
    %c0 = arith.constant 0 : index
    %c0_0 = arith.constant 0 : index
    %0 = vector.load %arg1[%c0, %c0_0] : memref<8x128xf32, #tpu.memory_space<vmem>>, vector<8x128xf32>
    %c0_1 = arith.constant 0 : index
    %c0_2 = arith.constant 0 : index
    %1 = vector.load %arg2[%c0_1, %c0_2] : memref<8x128xf32, #tpu.memory_space<vmem>>, vector<8x128xf32>
    %2 = arith.subf %0, %1 : vector<8x128xf32>
    %3 = arith.mulf %2, %2 : vector<8x128xf32>
    %cst = arith.constant dense<0.000000e+00> : vector<128xf32>
    %4 = vector.multi_reduction <add>, %3, %cst [0] : vector<8x128xf32> to vector<128xf32>
    %5 = vector.shape_cast %4 : vector<128xf32> to vector<1x128xf32>
    %c0_3 = arith.constant 0 : index
    %c0_4 = arith.constant 0 : index
    %6 = vector.load %arg3[%c0_3, %c0_4] : memref<1x128xf32, #tpu.memory_space<vmem>>, vector<1x128xf32>
    tpu.vector_store %arg3[%c0_3, %c0_4], %5 {strides = array<i32>} : memref<1x128xf32, #tpu.memory_space<vmem>>, vector<1x128xf32>,
    return
  }
  func.func @transform_0(%arg0: i32) -> (i32, i32) {
    %c0_i32 = arith.constant 0 : i32
    %c0_i32_0 = arith.constant 0 : i32
    return %arg0, %c0_i32 : i32, i32
  }
  func.func @transform_1(%arg0: i32) -> (i32, i32) {
    %c0_i32 = arith.constant 0 : i32
    %c0_i32_0 = arith.constant 0 : i32
    return %arg0, %c0_i32 : i32, i32
  }
  func.func @transform_2(%arg0: i32) -> (i32, i32) {
    %c0_i32 = arith.constant 0 : i32
    %c0_i32_0 = arith.constant 0 : i32
    return %c0_i32, %arg0 : i32, i32
  }
}

module attributes {stable_mosaic.version = 11 : i64} {
  func.func @_mse_partial_kernel(%arg0: i32, %arg1: memref<16x128xbf16, #tpu.memory_space<vmem>>, %arg2: memref<16x128xbf16, #tpu.memory_space<vmem>>, %arg3: memref<1x128xf32, #tpu.memory_space<vmem>>) attributes {dimension_semantics = [#tpu.dimension_semantics<parallel>], iteration_bounds = array<i64: 1>, scalar_prefetch = 0 : i64, scratch_operands = 0 : i64, tpu.core_type = #tpu.core_type<tc>, window_params = [{transform_indices = @transform_0, window_bounds = array<i64: 16, 128>}, {transform_indices = @transform_1, window_bounds = array<i64: 16, 128>}, {transform_indices = @transform_2, window_bounds = array<i64: 1, 128>}]} {
    %c0 = arith.constant 0 : index
    %c0_0 = arith.constant 0 : index
    %0 = vector.load %arg1[%c0, %c0_0] : memref<16x128xbf16, #tpu.memory_space<vmem>>, vector<16x128xbf16>
    %1 = arith.extf %0 : vector<16x128xbf16> to vector<16x128xf32>
    %c0_1 = arith.constant 0 : index
    %c0_2 = arith.constant 0 : index
    %2 = vector.load %arg2[%c0_1, %c0_2] : memref<16x128xbf16, #tpu.memory_space<vmem>>, vector<16x128xbf16>
    %3 = arith.extf %2 : vector<16x128xbf16> to vector<16x128xf32>
    %4 = arith.subf %1, %3 : vector<16x128xf32>
    %c16_i32 = arith.constant 16 : i32
    %5 = arith.muli %arg0, %c16_i32 : i32
    %6 = tpu.iota {dimensions = array<i32: 0>} : vector<16x128xi32>
    %7 = vector.broadcast %5 : i32 to vector<16x128xi32>
    %8 = arith.addi %7, %6 : vector<16x128xi32>
    %c2_i32 = arith.constant 2 : i32
    %9 = vector.broadcast %c2_i32 : i32 to vector<16x128xi32>
    %10 = arith.cmpi slt, %8, %9 : vector<16x128xi32>
    %cst = arith.constant 0.000000e+00 : f32
    %11 = vector.broadcast %cst : f32 to vector<16x128xf32>
    %12 = arith.select %10, %4, %11 : vector<16x128xi1>, vector<16x128xf32>
    %13 = arith.mulf %12, %12 : vector<16x128xf32>
    %cst_3 = arith.constant dense<0.000000e+00> : vector<128xf32>
    %14 = vector.multi_reduction <add>, %13, %cst_3 [0] : vector<16x128xf32> to vector<128xf32>
    %15 = vector.shape_cast %14 : vector<128xf32> to vector<1x128xf32>
    %c0_4 = arith.constant 0 : index
    %c0_5 = arith.constant 0 : index
    %16 = vector.load %arg3[%c0_4, %c0_5] : memref<1x128xf32, #tpu.memory_space<vmem>>, vector<1x128xf32>
    tpu.vector_store %arg3[%c0_4, %c0_5], %15 {strides = array<i32>} : memref<1x128xf32, #tpu.memory_space<vmem>>, vector<1x128xf32>,
    return
  }
  func.func @transform_0(%arg0: i32) -> (i32, i32) {
    %c0_i32 = arith.constant 0 : i32
    %c0_i32_0 = arith.constant 0 : i32
    return %arg0, %c0_i32 : i32, i32
  }
  func.func @transform_1(%arg0: i32) -> (i32, i32) {
    %c0_i32 = arith.constant 0 : i32
    %c0_i32_0 = arith.constant 0 : i32
    return %arg0, %c0_i32 : i32, i32
  }
  func.func @transform_2(%arg0: i32) -> (i32, i32) {
    %c0_i32 = arith.constant 0 : i32
    %c0_i32_0 = arith.constant 0 : i32
    return %c0_i32, %arg0 : i32, i32
  }
}

</mosaic_0001>

<bundles_post_ra>
// kernel: run.4
= control target key start
LH: loop header
LB: loop body
LE: loop exit
PB: predicated region body
PF: predicated region fallthrough
CT: control target
= control target key end

     0   :  { %s264_s9 = smov 0   ;;  %s278_s0 = inlined_call_operand.vmem [shape: f32[16,128], index: 0, kind: input, shape index: {}]   ;;  %s279_s1 = inlined_call_operand.vmem [shape: f32[16,128], index: 1, kind: input, shape index: {}]   ;;  %s280_s2 = inlined_call_operand.vmem [shape: f32[1,256], index: 2, kind: output, shape index: {}]  }
   0x1 LB: > { %s224_s10 = sadd.s32 4294967295, %s247_s9   ;;  %p228_p0 = scmp.ge.s32.totalorder %s247_s9, 1  ;;  %s247_s9 = sphi %s264_s9, %s12_s9  }
   0x2   : > { %p120_p1 = scmp.lt.s32.totalorder %s247_s9, 3 }
   0x4   : > { %p121_p2 = pnand %p228_p0, %p120_p1 }
   0x5   : > { %p143_p3 = scmp.lt.s32.totalorder (!%p121_p2), %s224_s10, 1 }
   0x6   : > { %124 = sbr.rel (%p121_p2) target bundleno = 33 (0x21), region = 28 }
   0xb   : > { %s282_s10 = smov (!%p143_p3, %s224_s10), 1 }
   0xc   : > { %s229_s11 = sshll.u32 %s282_s10, 3  ;;  %s153_s20 = scalar_lea.vmem %s280_s2, %s282_s10 }
   0xd   : > { %s146_s14 = scalar_lea.vmem %s278_s0, %s229_s11  ;;  %s150_s17 = scalar_lea.vmem %s279_s1, %s229_s11 }
   0xe   : > { %v154_v0 = vld [vmem:[%s146_s14] sm:$0xff] }
   0xf   : > { %v155_v1 = vld [vmem:[%s150_s17] sm:$0xff] }
  0x10   : > { %v156_v2 = vsub.f32 %v154_v0, %v155_v1 }
  0x12   : > { %v157_v3 = vmul.f32 %v156_v2, %v156_v2 }
  0x14   : > { %v158_v4 = vrot.slane %v157_v3, 4 }
  0x16   : > { %v159_v5 = vadd.f32 %v158_v4, %v157_v3 }
  0x18   : > { %v160_v6 = vrot.slane %v159_v5, 2 }
  0x1a   : > { %v161_v7 = vadd.f32 %v160_v6, %v159_v5 }
  0x1c   : > { %v162_v8 = vrot.slane %v161_v7, 1 }
  0x1e   : > { %v163_v9 = vadd.f32 %v162_v8, %v161_v7 }
  0x20   : > { %164 = vst [vmem:[%s153_s20] sm:$0x1] %v163_v9 }
  0x21 PF: > { %s12_s9 = sadd.s32 1, %s247_s9  }
  0x22   : > { %p9_p4 = scmp.ge.s32.totalorder %s12_s9, 4  }
  0x24   :  { %11 = sbr.rel (!%p9_p4) target bundleno = 1 (0x1), region = 61 }

// kernel: run.5
= control target key start
LH: loop header
LB: loop body
LE: loop exit
PB: predicated region body
PF: predicated region fallthrough
CT: control target
= control target key end

     0   :  { %v15_v0 = vlaneseq  ;;  %s57_s0 = inlined_call_operand.vmem [shape: f32[3,128], index: 0, kind: input, shape index: {}]   ;;  %s58_s1 = inlined_call_operand.vmem [shape: f32[3,128], index: 1, kind: input, shape index: {}]   ;;  %s59_s2 = inlined_call_operand.vmem [shape: f32[1,128], index: 2, kind: output, shape index: {}]  }
   0x1   :  { %v11_v1 = vld [vmem:[%s57_s0] sm:$0xff] }
   0x2   :  { %v12_v2 = vld [vmem:[%s58_s1] sm:$0xff]  ;;  %v16_v4 = vshrl.u32 %v15_v0, 7 }
   0x3   :  { %v13_v3 = vsub.f32 %v11_v1, %v12_v2 }
   0x4   :  { %vm19_vm0 = vcmp.lt.s32.totalorder %v16_v4, 3 }
   0x5   :  { %v20_v5 = vsel %vm19_vm0, %v13_v3, 0.0 }
   0x6   :  { %v21_v6 = vmul.f32 %v20_v5, %v20_v5 }
   0x8   :  { %v22_v7 = vrot.slane %v21_v6, 4 }
   0xa   :  { %v23_v8 = vadd.f32 %v22_v7, %v21_v6 }
   0xc   :  { %v24_v9 = vrot.slane %v23_v8, 2 }
   0xe   :  { %v25_v10 = vadd.f32 %v24_v9, %v23_v8 }
  0x10   :  { %v26_v11 = vrot.slane %v25_v10, 1 }
  0x12   :  { %v27_v12 = vadd.f32 %v26_v11, %v25_v10 }
  0x14   :  { %28 = vst [vmem:[%s59_s2] sm:$0x1] %v27_v12 }

// kernel: run.6
= control target key start
LH: loop header
LB: loop body
LE: loop exit
PB: predicated region body
PF: predicated region fallthrough
CT: control target
= control target key end

     0   :  { %s50_s0 = inlined_call_operand.vmem [shape: f32[8,128], index: 0, kind: input, shape index: {}]   ;;  %s51_s1 = inlined_call_operand.vmem [shape: f32[8,128], index: 1, kind: input, shape index: {}]   ;;  %s52_s2 = inlined_call_operand.vmem [shape: f32[1,128], index: 2, kind: output, shape index: {}]  }
   0x1   :  { %v11_v0 = vld [vmem:[%s50_s0] sm:$0xff] }
   0x2   :  { %v12_v1 = vld [vmem:[%s51_s1] sm:$0xff] }
   0x3   :  { %v13_v2 = vsub.f32 %v11_v0, %v12_v1 }
   0x5   :  { %v14_v3 = vmul.f32 %v13_v2, %v13_v2 }
   0x7   :  { %v15_v4 = vrot.slane %v14_v3, 4 }
   0x9   :  { %v16_v5 = vadd.f32 %v15_v4, %v14_v3 }
   0xb   :  { %v17_v6 = vrot.slane %v16_v5, 2 }
   0xd   :  { %v18_v7 = vadd.f32 %v17_v6, %v16_v5 }
   0xf   :  { %v19_v8 = vrot.slane %v18_v7, 1 }
  0x11   :  { %v20_v9 = vadd.f32 %v19_v8, %v18_v7 }
  0x13   :  { %21 = vst [vmem:[%s52_s2] sm:$0x1] %v20_v9 }

// kernel: run.7
= control target key start
LH: loop header
LB: loop body
LE: loop exit
PB: predicated region body
PF: predicated region fallthrough
CT: control target
= control target key end

     0   :  { %v52_v0 = vlaneseq  ;;  %v121_v4 = vmov 1983009808   ;;  %s164_s0 = inlined_call_operand.vmem [shape: bf16[2,128], index: 0, kind: input, shape index: {}]   ;;  %s165_s1 = inlined_call_operand.vmem [shape: bf16[2,128], index: 1, kind: input, shape index: {}]   ;;  %s166_s2 = inlined_call_operand.vmem [shape: f32[1,128], index: 2, kind: output, shape index: {}]  }
   0x1   :  { %v11_v1 = vld [vmem:[%s164_s0] sm:$0x1]  ;;  %v12_v2 = vld [vmem:[%s164_s0 + $0x1] sm:$0x1]  ;;  %v13_v3 = vld [vmem:[%s164_s0 + $0x2] sm:$0x1]  ;;  %v71_v5 = vunpack.c.l.s4 %v121_v4 }
   0x2   :  { %v14_v6 = vld [vmem:[%s164_s0 + $0x3] sm:$0x1]  ;;  %v19_v7 = vunpack.c.l.bf16 %v11_v1  ;;  %v20_v8 = vunpack.c.l.bf16 %v12_v2  ;;  %v21_v9 = vunpack.c.l.bf16 %v13_v3  ;;  %v27_v10 = vld [vmem:[%s165_s1] sm:$0x1]  ;;  %v28_v11 = vld [vmem:[%s165_s1 + $0x1] sm:$0x1] }
   0x3   :  { %v22_v12 = vunpack.c.l.bf16 %v14_v6  ;;  %v29_v13 = vld [vmem:[%s165_s1 + $0x2] sm:$0x1]  ;;  %v30_v14 = vld [vmem:[%s165_s1 + $0x3] sm:$0x1]  ;;  %v35_v15 = vunpack.c.l.bf16 %v27_v10  ;;  %v36_v16 = vunpack.c.l.bf16 %v28_v11  ;;  %v53_v17 = vshrl.u32 %v52_v0, 7 }
   0x4   :  { %v37_v18 = vunpack.c.l.bf16 %v29_v13  ;;  %v38_v19 = vunpack.c.l.bf16 %v30_v14  ;;  %v72_v20 = vunpack.c.0.s8 %v71_v5 }
   0x5   :  { %v43_v21 = vsub.f32 %v19_v7, %v35_v15  ;;  %v44_v22 = vsub.f32 %v20_v8, %v36_v16  ;;  %vm58_vm0 = vcmp.lt.s32.totalorder %v53_v17, 2 }
   0x6   :  { %v45_v23 = vsub.f32 %v21_v9, %v37_v18  ;;  %v46_v24 = vsub.f32 %v22_v12, %v38_v19  ;;  %v75_v25 = vsub.s32 %v72_v20, %v53_v17 }
   0x7   :  { %v68_v26 = vcombine.low %v43_v21, %v44_v22 }
   0x8   :  { %v69_v27 = vcombine.low %v45_v23, %v46_v24 }
   0x9   :  { %v76_v28 = vrot.slane %v68_v26, %v75_v25 }
   0xa   :  { %v83_v29 = vrot.slane %v69_v27, %v75_v25 }
   0xc   :  { %v84_v30 = vcombine.low %v76_v28, %v83_v29 }
   0xe   :  { %v104_v31 = vsel %vm58_vm0, %v84_v30, 0.0 }
   0xf   :  { %v106_v32 = vmul.f32 %v104_v31, %v104_v31 }
  0x11   :  { %v109_v33 = vrot.slane %v106_v32, 4 }
  0x13   :  { %v110_v34 = vadd.f32 %v109_v33, %v106_v32 }
  0x15   :  { %v111_v35 = vrot.slane %v110_v34, 2 }
  0x17   :  { %v112_v36 = vadd.f32 %v111_v35, %v110_v34 }
  0x19   :  { %v113_v37 = vrot.slane %v112_v36, 1 }
  0x1b   :  { %v114_v38 = vadd.f32 %v113_v37, %v112_v36 }
  0x1d   :  { %115 = vst [vmem:[%s166_s2] sm:$0x1] %v114_v38 }

</bundles_post_ra>
